<compile_context>
chip_gen: v6e
topology: v6e:2x2x1
jax: 0.10.0
libtpu: 0.0.40
codegen_flags: <defaults>
</compile_context>

<pallas_src>
import functools
import math

import jax
import jax.numpy as jnp
from jax.experimental import pallas as pl
from jax.experimental.pallas import tpu as pltpu


def _round_up(x: int, m: int) -> int:
    return ((x + m - 1) // m) * m


# Conservative VMEM working-set budget: leaves headroom inside v7x's 64 MiB
# physical VMEM; v5e/v6e (128 MiB) trivially satisfy it.
_VMEM_BUDGET = 32 * 1024 * 1024
# Below this many MACs, kernel launch + tiny-tile overheads dominate -> use a
# plain XLA dot instead of pallas_call.
_MIN_PALLAS_WORK = 1 << 20


# ----------------------------------------------------------------------------
# Pallas kernel: (tm, dim) bf16 x-tile @ (dim, tn) bf16 weight-tile -> f32 acc
# ----------------------------------------------------------------------------
def _linear_kernel(x_ref, w_ref, b_ref, o_ref):
    # x_ref: (tm, dim), w_ref: (dim, tn), b_ref: (1, tn) f32, o_ref: (tm, tn)
    acc = jnp.dot(x_ref[...], w_ref[...], preferred_element_type=jnp.float32)
    o_ref[...] = (acc + b_ref[...]).astype(o_ref.dtype)


def _choose_tiles(M, dim, out_dim, x_item, w_item, out_item):
    """Pick (tm, tn) so x/out double-buffers + resident weight fit the budget."""
    # --- N tile: whole weight resident when it fits half the budget,
    #     otherwise tile the output axis in 128-lane multiples.
    w_full_bytes = dim * out_dim * w_item
    if w_full_bytes <= _VMEM_BUDGET // 2:
        tn = out_dim
    else:
        tn = max(128, ((_VMEM_BUDGET // 2) // max(dim * w_item, 1)) // 128 * 128)
        tn = min(tn, out_dim)
    w_tile_bytes = dim * tn * w_item

    # --- M tile: largest multiple of 16 sublanes (bf16-safe) that fits next to
    #     a (possibly double-buffered) weight slice with double-buffered x/out.
    per_row = 2 * dim * x_item + 2 * tn * out_item
    rem = max(_VMEM_BUDGET - 2 * w_tile_bytes, 2 * 1024 * 1024)
    tm = rem // max(per_row, 1)
    tm = max(16, min(1024, (tm // 16) * 16))
    tm = min(tm, _round_up(max(M, 1), 16))
    return tm, tn


def _pallas_linear(x2d, w_t, b_row, out_dim, tm, tn, out_dtype):
    """x2d: (M, dim) bf16; w_t: (dim, out_dim) bf16; b_row: (1, out_dim) f32."""
    M, dim = x2d.shape
    gm = pl.cdiv(M, tm)
    gn = pl.cdiv(out_dim, tn)

    x_item = x2d.dtype.itemsize
    w_item = w_t.dtype.itemsize
    out_item = jnp.dtype(out_dtype).itemsize
    w_tile_bytes = dim * tn * w_item

    # Single-buffer the resident weight/bias when they are large: their block
    # index never changes per outer step, so double-buffering only wastes VMEM
    # (critical on v7x's 64 MiB). Tiny weights keep the default pipeline.
    single_buffer_w = w_tile_bytes > (2 << 20)

    def wspec(shape, imap):
        if single_buffer_w:
            return pl.BlockSpec(shape, imap, pipeline_mode=pl.Buffered(1))
        return pl.BlockSpec(shape, imap)

    need = (2 * tm * dim * x_item          # double-buffered x tile
            + 2 * tm * tn * out_item       # double-buffered out tile
            + (1 if single_buffer_w else 2) * w_tile_bytes
            + 2 * tn * b_row.dtype.itemsize)
    vmem_limit = int(min(max(need + (8 << 20), 32 << 20), 56 << 20))

    flops = 2 * M * dim * out_dim
    bytes_accessed = (gn * M * dim * x_item          # x re-read once per N tile
                      + dim * out_dim * w_item       # weight streamed once total
                      + gn * out_dim * b_row.dtype.itemsize
                      + M * out_dim * out_item)

    # TODO(synk): if per-step x DMA is exposed for very small dim, deepen the x
    # pipeline with pipeline_mode=pl.Buffered(3).
    # TODO(synk): for dim so large that a single (dim, tn) weight slice exceeds
    # VMEM, add a K grid axis with an f32 accumulator (pl.when init/finalize).
    return pl.pallas_call(
        _linear_kernel,
        out_shape=jax.ShapeDtypeStruct((M, out_dim), out_dtype),
        grid_spec=pltpu.PrefetchScalarGridSpec(
            num_scalar_prefetch=0,
            # N outer (weight slice resident across M), M inner (streamed).
            grid=(gn, gm),
            in_specs=[
                pl.BlockSpec((tm, dim), lambda j, i: (i, 0)),
                wspec((dim, tn), lambda j, i: (0, j)),
                wspec((1, tn), lambda j, i: (0, j)),
            ],
            out_specs=pl.BlockSpec((tm, tn), lambda j, i: (i, j)),
        ),
        compiler_params=pltpu.CompilerParams(
            # Both axes write independent output tiles -> megacore sharding.
            dimension_semantics=("parallel", "parallel"),
            vmem_limit_bytes=vmem_limit,
        ),
        cost_estimate=pl.CostEstimate(
            flops=flops, transcendentals=0, bytes_accessed=bytes_accessed),
    )(x2d, w_t, b_row)


@functools.partial(jax.jit, static_argnames=("out_dim",))
def _project(x, w_t, b_row, *, out_dim):
    """Apply the linear projection to the last axis of x (no pad/slice copies)."""
    orig_shape = x.shape
    dim = orig_shape[-1]
    out_dtype = x.dtype
    # bf16 activations: halves HBM traffic; f32 accumulation inside the kernel.
    x2d = x.reshape(-1, dim).astype(w_t.dtype)
    M = x2d.shape[0]

    if M * dim * out_dim < _MIN_PALLAS_WORK:
        # Tiny problem: one fused XLA dot beats kernel-launch overhead.
        out2d = (jnp.dot(x2d, w_t, preferred_element_type=jnp.float32)
                 + b_row).astype(out_dtype)
    else:
        tm, tn = _choose_tiles(M, dim, out_dim, x2d.dtype.itemsize,
                               w_t.dtype.itemsize, jnp.dtype(out_dtype).itemsize)
        out2d = _pallas_linear(x2d, w_t, b_row, out_dim, tm, tn, out_dtype)
    return out2d.reshape(*orig_shape[:-1], out_dim)


# ----------------------------------------------------------------------------
# Conditioner base class (proj_out is the Pallas compute; forward is abstract)
# ----------------------------------------------------------------------------
class Conditioner:
    def __init__(self, dim: int, output_dim: int, project_out: bool = False,
                 key=None, dtype=jnp.float32, compute_dtype=jnp.bfloat16):
        self.dim = dim
        self.output_dim = output_dim
        self.has_proj = (dim != output_dim) or project_out
        if self.has_proj:
            if key is None:
                key = jax.random.PRNGKey(0)
            kw, kb = jax.random.split(key)
            bound = 1.0 / math.sqrt(dim)
            # PyTorch convention: weight is (output_dim, dim).
            self.weight = jax.random.uniform(
                kw, (output_dim, dim), dtype=dtype, minval=-bound, maxval=bound)
            self.bias = jax.random.uniform(
                kb, (output_dim,), dtype=dtype, minval=-bound, maxval=bound)
            # Pre-transpose ONCE and store in the compute dtype (bf16): half the
            # HBM/VMEM footprint, MXU-native rate; bias stays f32 (added post-acc).
            self.w_t = self.weight.T.astype(compute_dtype)       # (dim, output_dim)
            self.b_row = self.bias.astype(jnp.float32).reshape(1, output_dim)
        else:
            self.weight = None
            self.bias = None
            self.w_t = None
            self.b_row = None

    def proj_out(self, x):
        if not self.has_proj:
            return x  # nn.Identity
        return _project(x, self.w_t, self.b_row, out_dim=self.output_dim)

    def forward(self, x, device=None):
        # Matches PyTorch: the base class's forward is abstract.
        raise NotImplementedError()

    def __call__(self, x, device=None):
        return self.forward(x, device)


class ArrayConditioner(Conditioner):
    """Minimal concrete conditioner: stacks per-example arrays (seq, dim) into
    (batch, seq, dim) and applies proj_out (the Pallas linear / Identity)."""

    def forward(self, xs, device=None):
        x = jnp.stack([jnp.asarray(v) for v in xs], axis=0)
        return self.proj_out(x)


# ----------------------------------------------------------------------------
# MultiConditioner: dict dispatch over conditioners (glue, matches PyTorch)
# ----------------------------------------------------------------------------
class MultiConditioner:
    def __init__(self, conditioners, default_keys=None):
        self.conditioners = dict(conditioners)
        self.default_keys = dict(default_keys or {})

    def forward(self, batch_metadata, device=None):
        output = {}
        for key, conditioner in self.conditioners.items():
            condition_key = key
            conditioner_inputs = []
            for x in batch_metadata:
                if condition_key not in x:
                    if condition_key in self.default_keys:
                        condition_key = self.default_keys[condition_key]
                    else:
                        raise ValueError(
                            f"Conditioner key {condition_key} not found in batch metadata")
                if isinstance(x[condition_key], list) or (
                        isinstance(x[condition_key], tuple)
                        and len(x[condition_key]) == 1):
                    conditioner_input = x[condition_key][0]
                else:
                    conditioner_input = x[condition_key]
                conditioner_inputs.append(conditioner_input)
            output[key] = conditioner(conditioner_inputs, device)
        return output

    def __call__(self, batch_metadata, device=None):
        return self.forward(batch_metadata, device)


if __name__ == "__main__":
    key = jax.random.PRNGKey(0)
    k_in, k_params = jax.random.split(key)

    # Small but above the tiny-problem fallback threshold so the Pallas kernel
    # is actually exercised (M = batch*seq = 128, K = 128, N = 256).
    batch, seq, dim, output_dim = 2, 64, 128, 256

    # Per-example metadata: each carries a (seq, dim) array under "prompt",
    # wrapped in a list to exercise the list-unwrapping branch.
    xs = jax.random.normal(k_in, (batch, seq, dim), dtype=jnp.float32)
    batch_metadata = [{"prompt": [xs[i]]} for i in range(batch)]

    # Two conditioners: one with a real projection, one Identity, and a
    # default_keys fallback ("prompt_id" -> "prompt").
    cond_proj = ArrayConditioner(dim=dim, output_dim=output_dim, key=k_params)
    cond_id = ArrayConditioner(dim=dim, output_dim=dim)  # Identity branch
    multi = MultiConditioner(
        conditioners={"prompt": cond_proj, "prompt_id": cond_id},
        default_keys={"prompt_id": "prompt"},
    )

    out = multi(batch_metadata, device=None)
    out = jax.tree_util.tree_map(jax.block_until_ready, out)

    # Reference 1: same bf16 operands / f32 accumulation as the kernel (tight).
    ref_bf16 = (jnp.dot(xs.astype(jnp.bfloat16), cond_proj.w_t,
                        preferred_element_type=jnp.float32) + cond_proj.b_row)
    # Reference 2: pure f32 math (loose tolerance due to bf16 inputs).
    ref_f32 = xs @ cond_proj.weight.T + cond_proj.bias

    assert out["prompt"].shape == (batch, seq, output_dim)
    assert jnp.allclose(out["prompt"], ref_bf16, atol=1e-3, rtol=1e-3)
    assert jnp.allclose(out["prompt"], ref_f32, atol=1e-1, rtol=1e-1)
    assert jnp.array_equal(out["prompt_id"], xs)

    print("KERNEL_OK")
</pallas_src>

<mosaic_0001>
module attributes {stable_mosaic.version = 11 : i64} {
  func.func @_linear_kernel(%arg0: i32, %arg1: i32, %arg2: memref<128x128xbf16, #tpu.memory_space<vmem>>, %arg3: memref<128x256xbf16, #tpu.memory_space<vmem>>, %arg4: memref<1x256xf32, #tpu.memory_space<vmem>>, %arg5: memref<128x256xf32, #tpu.memory_space<vmem>>) attributes {dimension_semantics = [#tpu.dimension_semantics<parallel>, #tpu.dimension_semantics<parallel>], iteration_bounds = array<i64: 1, 1>, scalar_prefetch = 0 : i64, scratch_operands = 0 : i64, tpu.core_type = #tpu.core_type<tc>, window_params = [{transform_indices = @transform_0, window_bounds = array<i64: 128, 128>}, {transform_indices = @transform_1, window_bounds = array<i64: 128, 256>}, {transform_indices = @transform_2, window_bounds = array<i64: 1, 256>}, {transform_indices = @transform_3, window_bounds = array<i64: 128, 256>}]} {
    %c0 = arith.constant 0 : index
    %c0_0 = arith.constant 0 : index
    %0 = vector.load %arg2[%c0, %c0_0] : memref<128x128xbf16, #tpu.memory_space<vmem>>, vector<128x128xbf16>
    %c0_1 = arith.constant 0 : index
    %c0_2 = arith.constant 0 : index
    %1 = vector.load %arg3[%c0_1, %c0_2] : memref<128x256xbf16, #tpu.memory_space<vmem>>, vector<128x256xbf16>
    %cst = arith.constant dense<0.000000e+00> : vector<128x256xf32>
    %2 = tpu.matmul %0, %1, %cst {dimension_numbers = #tpu.dot_dimension_numbers<[1], [0], [0], [1], [0, 0, 1, 1], [], []>} : vector<128x128xbf16>, vector<128x256xbf16>, vector<128x256xf32> -> vector<128x256xf32>
    %c0_3 = arith.constant 0 : index
    %c0_4 = arith.constant 0 : index
    %3 = vector.load %arg4[%c0_3, %c0_4] : memref<1x256xf32, #tpu.memory_space<vmem>>, vector<1x256xf32>
    %4 = vector.broadcast %3 : vector<1x256xf32> to vector<128x256xf32>
    %5 = arith.addf %2, %4 : vector<128x256xf32>
    %c0_5 = arith.constant 0 : index
    %c0_6 = arith.constant 0 : index
    %6 = vector.load %arg5[%c0_5, %c0_6] : memref<128x256xf32, #tpu.memory_space<vmem>>, vector<128x256xf32>
    tpu.vector_store %arg5[%c0_5, %c0_6], %5 {strides = array<i32>} : memref<128x256xf32, #tpu.memory_space<vmem>>, vector<128x256xf32>,
    return
  }
  func.func @transform_0(%arg0: i32, %arg1: i32) -> (i32, i32) {
    %c0_i32 = arith.constant 0 : i32
    %c0_i32_0 = arith.constant 0 : i32
    return %arg1, %c0_i32 : i32, i32
  }
  func.func @transform_1(%arg0: i32, %arg1: i32) -> (i32, i32) {
    %c0_i32 = arith.constant 0 : i32
    %c0_i32_0 = arith.constant 0 : i32
    return %c0_i32, %arg0 : i32, i32
  }
  func.func @transform_2(%arg0: i32, %arg1: i32) -> (i32, i32) {
    %c0_i32 = arith.constant 0 : i32
    %c0_i32_0 = arith.constant 0 : i32
    return %c0_i32, %arg0 : i32, i32
  }
  func.func @transform_3(%arg0: i32, %arg1: i32) -> (i32, i32) {
    %c0_i32 = arith.constant 0 : i32
    return %arg1, %arg0 : i32, i32
  }
}

</mosaic_0001>

<bundles_post_ra>
// kernel: _project.1
= control target key start
LH: loop header
LB: loop body
LE: loop exit
PB: predicated region body
PF: predicated region fallthrough
CT: control target
= control target key end

     0   :  { %v447_v2 = vmov 0   ;;  %s593_s0 = inlined_call_operand.vmem [shape: bf16[128,128], index: 0, kind: input, shape index: {}]   ;;  %s594_s1 = inlined_call_operand.vmem [shape: bf16[128,256], index: 1, kind: input, shape index: {}]   ;;  %s595_s2 = inlined_call_operand.vmem [shape: f32[1,256], index: 2, kind: input, shape index: {}]   ;;  %s596_s3 = inlined_call_operand.hbm [shape: f32[128,256], index: 3, kind: output, shape index: {}]  }
   0x1   :  { %v393_v0 = vld [vmem:[%s594_s1 + $0x74] ss:$8 sps:$4 sm:$0xff]   ;;  %v395_v1 = vld [vmem:[%s594_s1 + $0x70] ss:$8 sps:$4 sm:$0xff]   ;;  %220 = vmatprep.mubr.bf16.mxu0 %v447_v2  ;;  %260 = vmatprep.mubr.bf16.mxu1 %v447_v2  ;;  %v396_v3 = vld [vmem:[%s594_s1 + $0x64] ss:$8 sps:$4 sm:$0xff]  }
   0x2   :  { %188 = vmatprep.subr.bf16.mxu0 %v393_v0  ;;  %373 = vmatprep.subr.bf16.mxu1 %v393_v0  ;;  %v398_v4 = vld [vmem:[%s594_s1 + $0x60] ss:$8 sps:$4 sm:$0xff]   ;;  %v399_v5 = vld [vmem:[%s594_s1 + $0x54] ss:$8 sps:$4 sm:$0xff]   ;;  %v401_v6 = vld [vmem:[%s594_s1 + $0x50] ss:$8 sps:$4 sm:$0xff]  }
   0x3   :  { %189 = vmatpush1.bf16.msra.mxu0 %v395_v1  ;;  %381 = vmatpush1.bf16.msra.mxu1 %v395_v1  ;;  %v402_v7 = vld [vmem:[%s594_s1 + $0x44] ss:$8 sps:$4 sm:$0xff]   ;;  %v404_v8 = vld [vmem:[%s594_s1 + $0x40] ss:$8 sps:$4 sm:$0xff]   ;;  %v405_v9 = vld [vmem:[%s594_s1 + $0x34] ss:$8 sps:$4 sm:$0xff]  }
   0x4   :  { %190 = vmatprep.subr.bf16.mxu0 %v396_v3  ;;  %374 = vmatprep.subr.bf16.mxu1 %v396_v3  ;;  %v407_v10 = vld [vmem:[%s594_s1 + $0x30] ss:$8 sps:$4 sm:$0xff]   ;;  %v408_v11 = vld [vmem:[%s594_s1 + $0x24] ss:$8 sps:$4 sm:$0xff]   ;;  %v410_v12 = vld [vmem:[%s594_s1 + $0x20] ss:$8 sps:$4 sm:$0xff]  }
   0x7   :  { %191 = vmatpush1.bf16.msra.mxu0 %v398_v4  ;;  %382 = vmatpush1.bf16.msra.mxu1 %v398_v4 }
   0x8   :  { %192 = vmatprep.subr.bf16.mxu0 %v399_v5  ;;  %375 = vmatprep.subr.bf16.mxu1 %v399_v5 }
   0xb   :  { %193 = vmatpush1.bf16.msra.mxu0 %v401_v6  ;;  %383 = vmatpush1.bf16.msra.mxu1 %v401_v6 }
   0xc   :  { %194 = vmatprep.subr.bf16.mxu0 %v402_v7  ;;  %376 = vmatprep.subr.bf16.mxu1 %v402_v7 }
   0xf   :  { %195 = vmatpush1.bf16.msra.mxu0 %v404_v8  ;;  %384 = vmatpush1.bf16.msra.mxu1 %v404_v8 }
  0x10   :  { %196 = vmatprep.subr.bf16.mxu0 %v405_v9  ;;  %377 = vmatprep.subr.bf16.mxu1 %v405_v9 }
  0x13   :  { %197 = vmatpush1.bf16.msra.mxu0 %v407_v10  ;;  %385 = vmatpush1.bf16.msra.mxu1 %v407_v10 }
  0x14   :  { %8 = vsyncpa [#allocation3], 0  ;;  %198 = vmatprep.subr.bf16.mxu0 %v408_v11  ;;  %378 = vmatprep.subr.bf16.mxu1 %v408_v11  ;;  %v411_v13 = vld [vmem:[%s594_s1 + $0x14] ss:$8 sps:$4 sm:$0xff]   ;;  %v413_v14 = vld [vmem:[%s594_s1 + $0x10] ss:$8 sps:$4 sm:$0xff]   ;;  %v50_v25 = vlaneseq }
  0x15   :  { %v414_v15 = vld [vmem:[%s594_s1 + $0x4] ss:$8 sps:$4 sm:$0xff]   ;;  %v416_v16 = vld [vmem:[%s594_s1] ss:$8 sps:$4 sm:$0xff]   ;;  %v421_v21 = vld [vmem:[%s593_s0 + $0x10] sm:$0xff]  }
  0x16   :  { %v417_v17 = vld [vmem:[%s593_s0] sm:$0xff]   ;;  %v419_v19 = vld [vmem:[%s593_s0 + $0x8] sm:$0xff]   ;;  %v422_v22 = vld [vmem:[%s593_s0 + $0x30] sm:$0xff]   ;;  %v51_v26 = vshrl.u32 %v50_v25, 7 }
  0x17   :  { %199 = vmatpush1.bf16.msra.mxu0 %v410_v12  ;;  %386 = vmatpush1.bf16.msra.mxu1 %v410_v12  ;;  %v418_v18 = vld [vmem:[%s593_s0 + $0x20] sm:$0xff]   ;;  %v420_v20 = vld [vmem:[%s593_s0 + $0x28] sm:$0xff]   ;;  %v423_v23 = vld [vmem:[%s593_s0 + $0x18] sm:$0xff]  }
  0x18   :  { %200 = vmatprep.subr.bf16.mxu0 %v411_v13  ;;  %379 = vmatprep.subr.bf16.mxu1 %v411_v13  ;;  %v424_v24 = vld [vmem:[%s593_s0 + $0x38] sm:$0xff]   ;;  %v52_v27 = vsub.s32 0, %v51_v26  ;;  %v48_v28 = vld [vmem:[%s595_s2] sm:$0x3]  ;;  %v56_v29 = vsub.s32 1, %v51_v26  ;;  %s448_s0 = smov [#allocation2]  }
  0x19   :  { %s338_s2 = sshll.u32 %s448_s0, 4  ;;  %s339_s2 = int_to_ptr.vmem [resolvable:$true] %s338_s2 }
  0x1a   :  { %v554_v30 = vrot.slane %v48_v28, %v52_v27  ;;  %v556_v31 = vrot.slane %v48_v28, %v56_v29  ;;  %s425_s7 = scalar_lea.vmem %s339_s2, 4096  ;;  %p430_p1 = scmp.lt.s32.totalorder %s339_s2, %s339_s2 }
  0x1b   :  { %201 = vmatpush1.bf16.msra.mxu0 %v413_v14  ;;  %387 = vmatpush1.bf16.msra.mxu1 %v413_v14  ;;  %p426_p0 = scmp.ne.s32.totalorder %s339_s2, %s425_s7  ;;  %p431_p2 = scmp.lt.s32.totalorder %s425_s7, %s425_s7 }
  0x1c   :  { %202 = vmatprep.subr.bf16.mxu0 %v414_v15  ;;  %380 = vmatprep.subr.bf16.mxu1 %v414_v15 }
  0x1d   :  { %p432_p3 = por %p431_p2, %p430_p1 }
  0x1f   :  { %203 = vmatpush1.bf16.msra.mxu0 %v416_v16  ;;  %388 = vmatpush1.bf16.msra.mxu1 %v416_v16  ;;  %p433_p4 = pnand %p432_p3, %p426_p0 }
  0x22   :  { %221 = vmatmul.mubr.bf16.vlgmr.msra.gmra.mxu0 %v417_v17  ;;  %261 = vmatmul.mubr.bf16.vlgmr.msra.gmra.mxu1 %v418_v18 }
  0x23   :  { %230 = vmatprep.mubr.bf16.mxu0 %v447_v2  ;;  %270 = vmatprep.mubr.bf16.mxu1 %v447_v2 }
  0x2a   :  { %231 = vmatmul.mubr.bf16.gmra.mxu0 %v419_v19  ;;  %271 = vmatmul.mubr.bf16.gmra.mxu1 %v420_v20 }
  0x2b   :  { %240 = vmatprep.mubr.bf16.mxu0 %v447_v2  ;;  %280 = vmatprep.mubr.bf16.mxu1 %v447_v2 }
  0x32   :  { %241 = vmatmul.mubr.bf16.gmra.mxu0 %v421_v21  ;;  %281 = vmatmul.mubr.bf16.gmra.mxu1 %v422_v22 }
  0x33   :  { %250 = vmatprep.mubr.bf16.mxu0 %v447_v2  ;;  %290 = vmatprep.mubr.bf16.mxu1 %v447_v2 }
  0x3a   :  { %251 = vmatmul.mubr.bf16.gmra.mxu0 %v423_v23  ;;  %291 = vmatmul.mubr.bf16.gmra.mxu1 %v424_v24 }
  0xe2   :  { %v222_v32 = vpop.f32.mrf.mxu0  ;;  %v262_v33 = vpop.f32.mrf.mxu1 }
  0xe3   :  { %v223_v34 = vadd.f32 %v222_v32, %v554_v30  ;;  %v263_v35 = vadd.f32 %v262_v33, %v554_v30 }
  0xe4   :  { %v224_v36 = vpop.f32.mrf.mxu0  ;;  %v264_v37 = vpop.f32.mrf.mxu1 }
  0xe5   :  { %301 = vst [vmem:[#allocation2] sm:$0xff] %v223_v34  ;;  %317 = vst [vmem:[#allocation2 + $0x80] sm:$0xff] %v263_v35  ;;  %v225_v38 = vadd.f32 %v224_v36, %v556_v31  ;;  %v265_v39 = vadd.f32 %v264_v37, %v556_v31 }
  0xe6   :  { %v226_v40 = vpop.f32.mrf.mxu0  ;;  %v266_v41 = vpop.f32.mrf.mxu1 }
  0xe7   :  { %302 = vst [vmem:[#allocation2 + $0x8] sm:$0xff] %v225_v38  ;;  %318 = vst [vmem:[#allocation2 + $0x88] sm:$0xff] %v265_v39  ;;  %v227_v42 = vadd.f32 %v226_v40, %v554_v30  ;;  %v267_v43 = vadd.f32 %v266_v41, %v554_v30 }
  0xe8   :  { %v228_v44 = vpop.f32.mrf.mxu0  ;;  %v268_v45 = vpop.f32.mrf.mxu1 }
  0xe9   :  { %303 = vst [vmem:[#allocation2 + $0x10] sm:$0xff] %v227_v42  ;;  %319 = vst [vmem:[#allocation2 + $0x90] sm:$0xff] %v267_v43  ;;  %v229_v46 = vadd.f32 %v228_v44, %v556_v31  ;;  %v269_v47 = vadd.f32 %v268_v45, %v556_v31 }
  0xea   :  { %v232_v48 = vpop.f32.mrf.mxu0  ;;  %v272_v49 = vpop.f32.mrf.mxu1 }
  0xeb   :  { %304 = vst [vmem:[#allocation2 + $0x18] sm:$0xff] %v229_v46  ;;  %320 = vst [vmem:[#allocation2 + $0x98] sm:$0xff] %v269_v47  ;;  %v233_v50 = vadd.f32 %v232_v48, %v554_v30  ;;  %v273_v51 = vadd.f32 %v272_v49, %v554_v30 }
  0xec   :  { %v234_v52 = vpop.f32.mrf.mxu0  ;;  %v274_v53 = vpop.f32.mrf.mxu1 }
  0xed   :  { %305 = vst [vmem:[#allocation2 + $0x20] sm:$0xff] %v233_v50  ;;  %321 = vst [vmem:[#allocation2 + $0xa0] sm:$0xff] %v273_v51  ;;  %v235_v54 = vadd.f32 %v234_v52, %v556_v31  ;;  %v275_v55 = vadd.f32 %v274_v53, %v556_v31 }
  0xee   :  { %v236_v56 = vpop.f32.mrf.mxu0  ;;  %v276_v57 = vpop.f32.mrf.mxu1 }
  0xef   :  { %306 = vst [vmem:[#allocation2 + $0x28] sm:$0xff] %v235_v54  ;;  %322 = vst [vmem:[#allocation2 + $0xa8] sm:$0xff] %v275_v55  ;;  %v237_v58 = vadd.f32 %v236_v56, %v554_v30  ;;  %v277_v59 = vadd.f32 %v276_v57, %v554_v30 }
  0xf0   :  { %v238_v60 = vpop.f32.mrf.mxu0  ;;  %v278_v61 = vpop.f32.mrf.mxu1 }
  0xf1   :  { %307 = vst [vmem:[#allocation2 + $0x30] sm:$0xff] %v237_v58  ;;  %323 = vst [vmem:[#allocation2 + $0xb0] sm:$0xff] %v277_v59  ;;  %v239_v62 = vadd.f32 %v238_v60, %v556_v31  ;;  %v279_v63 = vadd.f32 %v278_v61, %v556_v31 }
  0xf2   :  { %v242_v0 = vpop.f32.mrf.mxu0  ;;  %v282_v1 = vpop.f32.mrf.mxu1 }
  0xf3   :  { %308 = vst [vmem:[#allocation2 + $0x38] sm:$0xff] %v239_v62  ;;  %324 = vst [vmem:[#allocation2 + $0xb8] sm:$0xff] %v279_v63  ;;  %v243_v2 = vadd.f32 %v242_v0, %v554_v30  ;;  %v283_v3 = vadd.f32 %v282_v1, %v554_v30 }
  0xf4   :  { %v244_v4 = vpop.f32.mrf.mxu0  ;;  %v284_v5 = vpop.f32.mrf.mxu1 }
  0xf5   :  { %309 = vst [vmem:[#allocation2 + $0x40] sm:$0xff] %v243_v2  ;;  %325 = vst [vmem:[#allocation2 + $0xc0] sm:$0xff] %v283_v3  ;;  %v245_v6 = vadd.f32 %v244_v4, %v556_v31  ;;  %v285_v7 = vadd.f32 %v284_v5, %v556_v31 }
  0xf6   :  { %v246_v8 = vpop.f32.mrf.mxu0  ;;  %v286_v9 = vpop.f32.mrf.mxu1 }
  0xf7   :  { %310 = vst [vmem:[#allocation2 + $0x48] sm:$0xff] %v245_v6  ;;  %326 = vst [vmem:[#allocation2 + $0xc8] sm:$0xff] %v285_v7  ;;  %v247_v10 = vadd.f32 %v246_v8, %v554_v30  ;;  %v287_v11 = vadd.f32 %v286_v9, %v554_v30 }
  0xf8   :  { %v248_v12 = vpop.f32.mrf.mxu0  ;;  %v288_v13 = vpop.f32.mrf.mxu1 }
  0xf9   :  { %311 = vst [vmem:[#allocation2 + $0x50] sm:$0xff] %v247_v10  ;;  %327 = vst [vmem:[#allocation2 + $0xd0] sm:$0xff] %v287_v11  ;;  %v249_v14 = vadd.f32 %v248_v12, %v556_v31  ;;  %v289_v15 = vadd.f32 %v288_v13, %v556_v31 }
  0xfa   :  { %v252_v16 = vpop.f32.mrf.mxu0  ;;  %v292_v17 = vpop.f32.mrf.mxu1 }
  0xfb   :  { %312 = vst [vmem:[#allocation2 + $0x58] sm:$0xff] %v249_v14  ;;  %328 = vst [vmem:[#allocation2 + $0xd8] sm:$0xff] %v289_v15  ;;  %v253_v18 = vadd.f32 %v252_v16, %v554_v30  ;;  %v293_v19 = vadd.f32 %v292_v17, %v554_v30 }
  0xfc   :  { %v254_v20 = vpop.f32.mrf.mxu0  ;;  %v294_v21 = vpop.f32.mrf.mxu1 }
  0xfd   :  { %313 = vst [vmem:[#allocation2 + $0x60] sm:$0xff] %v253_v18  ;;  %329 = vst [vmem:[#allocation2 + $0xe0] sm:$0xff] %v293_v19  ;;  %v255_v22 = vadd.f32 %v254_v20, %v556_v31  ;;  %v295_v23 = vadd.f32 %v294_v21, %v556_v31 }
  0xfe   :  { %v256_v24 = vpop.f32.mrf.mxu0  ;;  %v296_v25 = vpop.f32.mrf.mxu1 }
  0xff   :  { %314 = vst [vmem:[#allocation2 + $0x68] sm:$0xff] %v255_v22  ;;  %330 = vst [vmem:[#allocation2 + $0xe8] sm:$0xff] %v295_v23  ;;  %v257_v26 = vadd.f32 %v256_v24, %v554_v30  ;;  %v297_v27 = vadd.f32 %v296_v25, %v554_v30 }
 0x100   :  { %v258_v28 = vpop.f32.mrf.mxu0  ;;  %v298_v29 = vpop.f32.mrf.mxu1 }
 0x101   :  { %315 = vst [vmem:[#allocation2 + $0x70] sm:$0xff] %v257_v26  ;;  %331 = vst [vmem:[#allocation2 + $0xf0] sm:$0xff] %v297_v27  ;;  %v259_v32 = vadd.f32 %v258_v28, %v556_v31  ;;  %v299_v33 = vadd.f32 %v298_v29, %v556_v31 }
 0x103   :  { %316 = vst [vmem:[#allocation2 + $0x78] sm:$0xff] %v259_v32  ;;  %332 = vst [vmem:[#allocation2 + $0xf8] sm:$0xff] %v299_v33 }
 0x104   :  { %436 = shalt.err (!%p433_p4)
}
 0x105   :  { %s449_s8 = smov 256   ;;  %s450_s9 = smov 16  }
 0x106   :  { %344 = dma.vmem_to_hbm [thread:$0]  %s339_s2, 4096, %s596_s3, [#allocation3], %s449_s8, %s449_s8, %s450_s9  }
 0x107   :  { %445 = dma.done.wait [#allocation3], 4096  }
 0x108   :  { %446 = vsyncadd [#allocation3], 4294963200 }
 0x109   :  { %348 = vsyncpa [#allocation3], 1 }

</bundles_post_ra>
